<compile_context>
chip_gen: v6e
topology: v6e:2x2x1
jax: 0.10.0
libtpu: 0.0.40
codegen_flags: <defaults>
</compile_context>

<pallas_src>
import functools
import math

import jax
import jax.numpy as jnp
from jax.experimental import pallas as pl
from jax.experimental.pallas import tpu as pltpu

LANE = 128
_SUBLANE = 8
# Above v5e's 16 MiB default scoped limit, at/below v6e & v7x defaults, and
# well within every chip's physical VMEM.
_VMEM_LIMIT_BYTES = 32 * 1024 * 1024


def _round_up(x, m):
    return ((x + m - 1) // m) * m


def _chip_plan():
    """Returns (parts, leading-axis semantics, default f32 tile_rows)."""
    try:
        kind = jax.devices()[0].device_kind.lower()
    except Exception:
        return 1, pltpu.PARALLEL, 4096
    if "v7" in kind or "7x" in kind:
        # Two TensorCores per chip: shard the leading grid axis across them
        # and use bigger (~4 MiB/input) steps to match 3.2 TB/s HBM.
        return 2, pltpu.CORE_PARALLEL, 8192
    if "v5p" in kind or "v4" in kind:
        # Megacore: plain "parallel" splits the grid across the fused cores.
        return 2, pltpu.PARALLEL, 4096
    # v5e / v6e: single TensorCore -> no leading split (avoids the clamped
    # duplicate block and the always-on mask the split would force).
    return 1, pltpu.PARALLEL, 4096


def _ssd_kernel(yhat_ref, y_ref, o_ref, *, tile_rows, valid_rows,
                steps_per_part, need_mask):
    i = pl.program_id(1)

    @pl.when(i == 0)
    def _():
        o_ref[...] = jnp.zeros_like(o_ref)

    d = yhat_ref[...].astype(jnp.float32) - y_ref[...].astype(jnp.float32)
    d2 = d * d

    def fold(v):
        # Fold (tile_rows, 128) into the resident (8, 128) accumulator: VPU.
        o_ref[0] += v.reshape(tile_rows // _SUBLANE, _SUBLANE, LANE).sum(axis=0)

    if need_mask:
        # Static flag: code below only exists when tiling is inexact, and the
        # mask itself only runs on the (rare) edge / clamped-duplicate blocks.
        c = pl.program_id(0)
        row0 = (c * steps_per_part + i) * tile_rows

        @pl.when(row0 + tile_rows <= valid_rows)
        def _():
            fold(d2)

        @pl.when(row0 + tile_rows > valid_rows)
        def _():
            row_ids = row0 + jax.lax.broadcasted_iota(
                jnp.int32, (tile_rows, 1), 0)
            fold(jnp.where(row_ids < valid_rows, d2, 0.0))
    else:
        fold(d2)


def _bulk_ssd(yh2, y2, rows, tr, parts, lead_sem, itemsize):
    """Partial sums of squared differences over a (rows, 128) slab."""
    steps_total = pl.cdiv(rows, tr)
    if steps_total < parts:
        parts = 1
        lead_sem = pltpu.PARALLEL
    steps_per_part = pl.cdiv(steps_total, parts)

    need_mask = parts * steps_per_part * tr != rows
    needs_clamp = parts * steps_per_part > steps_total

    if needs_clamp:
        # Keep the DMA in bounds for fully-out-of-range duplicate blocks
        # (odd block counts split across parts); they are masked to zero.
        def in_map(c, i):
            return (jnp.minimum(c * steps_per_part + i, steps_total - 1), 0)
    else:
        def in_map(c, i):
            return (c * steps_per_part + i, 0)

    kernel = functools.partial(
        _ssd_kernel, tile_rows=tr, valid_rows=rows,
        steps_per_part=steps_per_part, need_mask=need_mask)

    n_bulk = rows * LANE
    cost = pl.CostEstimate(
        flops=3 * n_bulk,
        transcendentals=0,
        bytes_accessed=2 * n_bulk * itemsize + parts * _SUBLANE * LANE * 4)

    return pl.pallas_call(
        kernel,
        out_shape=jax.ShapeDtypeStruct((parts, _SUBLANE, LANE), jnp.float32),
        grid_spec=pltpu.PrefetchScalarGridSpec(
            num_scalar_prefetch=0,
            grid=(parts, steps_per_part),
            in_specs=[
                pl.BlockSpec((tr, LANE), in_map),
                pl.BlockSpec((tr, LANE), in_map),
            ],
            out_specs=pl.BlockSpec((1, _SUBLANE, LANE), lambda c, i: (c, 0, 0)),
        ),
        compiler_params=pltpu.CompilerParams(
            dimension_semantics=(lead_sem, pltpu.ARBITRARY),
            vmem_limit_bytes=_VMEM_LIMIT_BYTES),
        cost_estimate=cost,
    )(yh2, y2)


def rmse_loss(yhat, y, *, tile_rows=None):
    assert yhat.shape == y.shape, "yhat and y must have the same shape"
    total = math.prod(yhat.shape)

    parts, lead_sem, default_tr = _chip_plan()
    if tile_rows is None:
        tile_rows = default_tr

    yh_flat = jnp.ravel(yhat)
    y_flat = jnp.ravel(y)

    lane_rem = total % LANE
    n_bulk = total - lane_rem

    tail_ssd = jnp.float32(0.0)
    if lane_rem:
        # Rare (<128 element) non-lane-aligned remainder: tiny plain-JAX sum.
        dt = (yh_flat[n_bulk:].astype(jnp.float32)
              - y_flat[n_bulk:].astype(jnp.float32))
        tail_ssd = jnp.sum(dt * dt)
        yh_flat = yh_flat[:n_bulk]
        y_flat = y_flat[:n_bulk]

    if n_bulk == 0:
        # Degenerate tiny input: nothing for the kernel to do.
        return jnp.sqrt(tail_ssd / jnp.float32(total))

    rows = n_bulk // LANE

    # Dtype-scaled tiling: keep HBM bytes per grid step constant (~2-4 MiB
    # per input).  Sublane multiple: 8 for 4-byte dtypes, 16 bf16, 32 int8.
    itemsize = min(jnp.dtype(yhat.dtype).itemsize, jnp.dtype(y.dtype).itemsize)
    scale = max(1, 4 // max(1, itemsize))
    sub = _SUBLANE * scale
    tr = min(_round_up(tile_rows * scale, sub), _round_up(rows, sub))

    yh2 = yh_flat.reshape(rows, LANE)   # metadata-only reshape
    y2 = y_flat.reshape(rows, LANE)

    try:
        partials = _bulk_ssd(yh2, y2, rows, tr, parts, lead_sem, itemsize)
    except Exception:
        # Conservative fallback (e.g. if the 2-TC split or the large tile is
        # rejected on this chip/toolchain): single part, ~2 MiB/input steps.
        tr_safe = min(tr, _round_up(4096 * scale, sub))
        if parts == 1 and tr <= tr_safe:
            raise
        partials = _bulk_ssd(yh2, y2, rows, tr_safe, 1, pltpu.PARALLEL,
                             itemsize)

    # Final combine: one small cross-lane reduce + sqrt in plain JAX.
    ssd = jnp.sum(partials) + tail_ssd
    return jnp.sqrt(ssd / jnp.float32(total))


if __name__ == "__main__":
    key = jax.random.PRNGKey(0)
    k1, k2 = jax.random.split(key)
    # Small shapes consistent with a generic regression target.
    yhat = jax.random.normal(k1, (2, 4, 16, 16), dtype=jnp.float32)
    y = jax.random.normal(k2, (2, 4, 16, 16), dtype=jnp.float32)

    loss = rmse_loss(yhat, y)
    jax.block_until_ready(loss)

    # Sanity check against plain-JAX reference.
    ref = jnp.sqrt(jnp.mean((yhat - y) ** 2))
    assert jnp.allclose(loss, ref, rtol=1e-5, atol=1e-6), (loss, ref)

    print("KERNEL_OK")
</pallas_src>

<mosaic_0001>
module attributes {stable_mosaic.version = 11 : i64} {
  func.func @_ssd_kernel(%arg0: i32, %arg1: i32, %arg2: memref<16x128xf32, #tpu.memory_space<vmem>>, %arg3: memref<16x128xf32, #tpu.memory_space<vmem>>, %arg4: memref<1x8x128xf32, #tpu.memory_space<vmem>>) attributes {dimension_semantics = [#tpu.dimension_semantics<parallel>, #tpu.dimension_semantics<arbitrary>], iteration_bounds = array<i64: 1, 1>, scalar_prefetch = 0 : i64, scratch_operands = 0 : i64, tpu.core_type = #tpu.core_type<tc>, window_params = [{transform_indices = @transform_0, window_bounds = array<i64: 16, 128>}, {transform_indices = @transform_1, window_bounds = array<i64: 16, 128>}, {transform_indices = @transform_2, window_bounds = array<i64: 1, 8, 128>}]} {
    %c0_i32 = arith.constant 0 : i32
    %0 = arith.cmpi eq, %arg1, %c0_i32 : i32
    %1 = arith.extui %0 : i1 to i32
    %c0_i32_0 = arith.constant 0 : i32
    %2 = arith.cmpi ne, %1, %c0_i32_0 : i32
    scf.if %2 {
      %cst_10 = arith.constant 0.000000e+00 : f32
      %15 = vector.broadcast %cst_10 : f32 to vector<1x8x128xf32>
      %c0_11 = arith.constant 0 : index
      %c0_12 = arith.constant 0 : index
      %c0_13 = arith.constant 0 : index
      %16 = vector.load %arg4[%c0_11, %c0_12, %c0_13] : memref<1x8x128xf32, #tpu.memory_space<vmem>>, vector<1x8x128xf32>
      tpu.vector_store %arg4[%c0_11, %c0_12, %c0_13], %15 {strides = array<i32>} : memref<1x8x128xf32, #tpu.memory_space<vmem>>, vector<1x8x128xf32>,
    } else {
    }
    %c0 = arith.constant 0 : index
    %c0_1 = arith.constant 0 : index
    %3 = vector.load %arg2[%c0, %c0_1] : memref<16x128xf32, #tpu.memory_space<vmem>>, vector<16x128xf32>
    %c0_2 = arith.constant 0 : index
    %c0_3 = arith.constant 0 : index
    %4 = vector.load %arg3[%c0_2, %c0_3] : memref<16x128xf32, #tpu.memory_space<vmem>>, vector<16x128xf32>
    %5 = arith.subf %3, %4 : vector<16x128xf32>
    %6 = arith.mulf %5, %5 : vector<16x128xf32>
    %c0_4 = arith.constant 0 : index
    %c0_5 = arith.constant 0 : index
    %c0_6 = arith.constant 0 : index
    %7 = vector.load %arg4[%c0_4, %c0_5, %c0_6] : memref<1x8x128xf32, #tpu.memory_space<vmem>>, vector<1x8x128xf32>
    %8 = vector.shape_cast %7 : vector<1x8x128xf32> to vector<8x128xf32>
    %9 = vector.shape_cast %6 : vector<16x128xf32> to vector<2x8x128xf32>
    %cst = arith.constant dense<0.000000e+00> : vector<8x128xf32>
    %10 = vector.multi_reduction <add>, %9, %cst [0] : vector<2x8x128xf32> to vector<8x128xf32>
    %11 = arith.addf %8, %10 : vector<8x128xf32>
    %c0_7 = arith.constant 0 : index
    %c0_8 = arith.constant 0 : index
    %c0_9 = arith.constant 0 : index
    %12 = vector.load %arg4[%c0_7, %c0_8, %c0_9] : memref<1x8x128xf32, #tpu.memory_space<vmem>>, vector<1x8x128xf32>
    %13 = vector.shape_cast %12 : vector<1x8x128xf32> to vector<8x128xf32>
    %14 = vector.shape_cast %11 : vector<8x128xf32> to vector<1x8x128xf32>
    tpu.vector_store %arg4[%c0_7, %c0_8, %c0_9], %14 {strides = array<i32>} : memref<1x8x128xf32, #tpu.memory_space<vmem>>, vector<1x8x128xf32>,
    return
  }
  func.func @transform_0(%arg0: i32, %arg1: i32) -> (i32, i32) {
    %c1_i32 = arith.constant 1 : i32
    %0 = arith.muli %arg0, %c1_i32 : i32
    %1 = arith.addi %0, %arg1 : i32
    %c0_i32 = arith.constant 0 : i32
    %c0_i32_0 = arith.constant 0 : i32
    return %1, %c0_i32 : i32, i32
  }
  func.func @transform_1(%arg0: i32, %arg1: i32) -> (i32, i32) {
    %c1_i32 = arith.constant 1 : i32
    %0 = arith.muli %arg0, %c1_i32 : i32
    %1 = arith.addi %0, %arg1 : i32
    %c0_i32 = arith.constant 0 : i32
    %c0_i32_0 = arith.constant 0 : i32
    return %1, %c0_i32 : i32, i32
  }
  func.func @transform_2(%arg0: i32, %arg1: i32) -> (i32, i32, i32) {
    %c0_i32 = arith.constant 0 : i32
    %c0_i32_0 = arith.constant 0 : i32
    %c0_i32_1 = arith.constant 0 : i32
    return %arg0, %c0_i32, %c0_i32_0 : i32, i32, i32
  }
}

</mosaic_0001>

<bundles_post_ra>
// kernel: tpu_custom_call.1
= control target key start
LH: loop header
LB: loop body
LE: loop exit
PB: predicated region body
PF: predicated region fallthrough
CT: control target
= control target key end

     0   :  { %7 = vsyncpa [#allocation3], 0  ;;  %s186_s0 = inlined_call_operand.hbm [shape: f32[16,128], index: 0, kind: input, shape index: {}]   ;;  %s187_s1 = inlined_call_operand.hbm [shape: f32[16,128], index: 1, kind: input, shape index: {}]   ;;  %s188_s2 = inlined_call_operand.hbm [shape: f32[1,8,128], index: 2, kind: output, shape index: {}]  }
   0x1   :  { %8 = vsyncpa [#allocation6], 0 }
   0x2   :  { %9 = vsyncpa [#allocation4], 0  ;;  %s157_s9 = smov [#allocation2]  }
   0x3   :  { %s19_s10 = sshll.u32 %s157_s9, 4  ;;  %s20_s10 = int_to_ptr.vmem [resolvable:$true] %s19_s10 }
   0x4   :  { %s99_s11 = scalar_lea.vmem %s20_s10, 256  ;;  %p104_p1 = scmp.lt.s32.totalorder %s20_s10, %s20_s10 }
   0x5   :  { %p100_p0 = scmp.ne.s32.totalorder %s20_s10, %s99_s11  ;;  %p105_p2 = scmp.lt.s32.totalorder %s99_s11, %s99_s11 }
   0x7   :  { %p106_p3 = por %p105_p2, %p104_p1 }
   0x9   :  { %p107_p4 = pnand %p106_p3, %p100_p0 }
   0xb   :  { %110 = shalt.err (!%p107_p4)
}
   0xc   :  { %s158_s12 = smov 128   ;;  %s159_s13 = smov 8  }
   0xd   :  { %25 = dma.hbm_to_vmem [thread:$0]  %s186_s0, 256, %s20_s10, [#allocation3], %s158_s12, %s158_s12, %s159_s13  }
   0xe   :  { %s160_s16 = smov [#allocation5]  }
   0xf   :  { %s35_s17 = sshll.u32 %s160_s16, 4  ;;  %s36_s17 = int_to_ptr.vmem [resolvable:$true] %s35_s17 }
  0x10   :  { %s119_s18 = scalar_lea.vmem %s36_s17, 256  ;;  %p124_p6 = scmp.lt.s32.totalorder %s36_s17, %s36_s17 }
  0x11   :  { %p120_p5 = scmp.ne.s32.totalorder %s36_s17, %s119_s18  ;;  %p125_p7 = scmp.lt.s32.totalorder %s119_s18, %s119_s18 }
  0x13   :  { %p126_p8 = por %p125_p7, %p124_p6 }
  0x15   :  { %p127_p9 = pnand %p126_p8, %p120_p5 }
  0x17   :  { %130 = shalt.err (!%p127_p9)
}
  0x18   :  { %41 = dma.hbm_to_vmem [thread:$0]  %s187_s1, 256, %s36_s17, [#allocation6], %s158_s12, %s158_s12, %s159_s13  }
  0x19   :  { %151 = dma.done.wait [#allocation3], 256  }
  0x1a   :  { %152 = vsyncadd [#allocation3], 4294967040 }
  0x1b   :  { %153 = dma.done.wait [#allocation6], 256  }
  0x1c   :  { %154 = vsyncadd [#allocation6], 4294967040  ;;  %v57_v0 = vld [vmem:[#allocation2] sm:$0xff]  ;;  %v58_v1 = vld [vmem:[#allocation2 + $0x8] sm:$0xff]  ;;  %s161_s0 = smov [#allocation7]  }
  0x1d   :  { %v59_v2 = vld [vmem:[#allocation5] sm:$0xff]  ;;  %v60_v3 = vld [vmem:[#allocation5 + $0x8] sm:$0xff]  ;;  %s75_s21 = sshll.u32 %s161_s0, 4  ;;  %s76_s21 = int_to_ptr.vmem [resolvable:$true] %s75_s21 }
  0x1e   :  { %v61_v4 = vsub.f32 %v57_v0, %v59_v2  ;;  %v62_v5 = vsub.f32 %v58_v1, %v60_v3  ;;  %s131_s22 = scalar_lea.vmem %s76_s21, 128  ;;  %p136_p11 = scmp.lt.s32.totalorder %s76_s21, %s76_s21 }
  0x1f   :  { %p132_p10 = scmp.ne.s32.totalorder %s76_s21, %s131_s22  ;;  %p137_p12 = scmp.lt.s32.totalorder %s131_s22, %s131_s22 }
  0x20   :  { %v63_v6 = vmul.f32 %v61_v4, %v61_v4  ;;  %v64_v7 = vmul.f32 %v62_v5, %v62_v5 }
  0x21   :  { %p138_p13 = por %p137_p12, %p136_p11 }
  0x22   :  { %v66_v8 = vadd.f32 %v64_v7, %v63_v6 }
  0x23   :  { %p139_p0 = pnand %p138_p13, %p132_p10 }
  0x24   :  { %68 = vst [vmem:[#allocation7] sm:$0xff] %v66_v8 }
  0x25   :  { %142 = shalt.err (!%p139_p0)
}
  0x26   :  { %78 = dma.vmem_to_hbm [thread:$0]  %s76_s21, 128, %s188_s2, [#allocation4]  }
  0x27   :  { %155 = dma.done.wait [#allocation4], 128  }
  0x28   :  { %156 = vsyncadd [#allocation4], 4294967168 }
  0x29   :  { %82 = vsyncpa [#allocation3], 1 }
  0x2a   :  { %83 = vsyncpa [#allocation6], 1 }
  0x2b   :  { %84 = vsyncpa [#allocation4], 1 }

</bundles_post_ra>
